<compile_context>
chip_gen: v5e
topology: v5e:2x2
jax: 0.10.0
libtpu: 0.0.40
codegen_flags: <defaults>
</compile_context>

<pallas_src>
import functools

import jax
import jax.numpy as jnp
from jax import lax
from jax.experimental import pallas as pl
from jax.experimental.pallas import tpu as pltpu


# ------------------------- Pallas kernel (hot path) -------------------------

def _make_downsample_kernel(ho: int, wr: int):
    """ho: output rows per image; wr: padded half-width (= Wo + 1)."""
    m = ho * wr  # flattened output pixels per image (incl. 1 halo column per row)

    def kernel(x_ref, w_ref, b_ref, o_ref):
        # x_ref: (1, R, 4*Cin)        bf16  space-to-depth, row-flattened padded image
        # w_ref: (2, 2, Cout, 4*Cin)  bf16  conv weight, BN scale folded, rearranged
        # b_ref: (Cout, 1)            f32   folded BN bias
        # o_ref: (1, Cout, Ho*Wr)     f32   lane-dense output (pixels in lanes)
        acc = None
        for dh in (0, 1):
            for dw in (0, 1):
                start = dh * wr + dw                       # static offset
                xs = x_ref[0, start:start + m, :]          # (M, 4*Cin) bf16, contiguous rows
                w = w_ref[dh, dw]                          # (Cout, 4*Cin) bf16
                # NT matmul on the MXU: (Cout, 4Cin) x (M, 4Cin)^T -> (Cout, M), f32 acc.
                p = lax.dot_general(
                    w, xs,
                    (((1,), (1,)), ((), ())),
                    preferred_element_type=jnp.float32,
                )
                acc = p if acc is None else acc + p
        y = acc + b_ref[...]                               # BN shift, broadcast over lanes
        o_ref[0] = jnp.where(y > 0.0, y, 0.1 * y).astype(o_ref.dtype)  # LeakyReLU(0.1)

    return kernel


# ------------------------------ JAX wrapper ---------------------------------

@functools.partial(jax.jit, static_argnames=("eps",))
def downsample_forward(x_nchw, conv_w, gamma, beta, running_mean, running_var,
                       eps=1e-5):
    """DownSample forward. x_nchw: (N, Cin, H, W) -> (N, Cout, H/2, W/2)."""
    N, Cin, H, W = x_nchw.shape
    Cout = conv_w.shape[0]
    if H % 2 or W % 2:
        raise ValueError("DownSample Pallas kernel requires even spatial dims")
    Ho, Wo = H // 2, W // 2
    Wr = Wo + 1          # padded half-width
    Hr = Ho + 2          # Ho + 1 real padded rows + 1 extra zero row so the
                         # (dh=1, dw=1) shifted window stays in bounds

    # Single fused XLA repack (one read of x, one bf16 write):
    # NCHW -> NHWC, zero-pad (top/left 1, bottom 3, right 1), 2x2 space-to-depth,
    # flatten (row, col) -> rows so shifted conv windows become contiguous row ranges.
    x = jnp.transpose(x_nchw, (0, 2, 3, 1)).astype(jnp.float32)
    xp = jnp.pad(x, ((0, 0), (1, 3), (1, 1), (0, 0)))          # (N, 2*Hr, 2*Wr, Cin)
    x2 = (xp.reshape(N, Hr, 2, Wr, 2, Cin)                     # (n, hr, ph, wr, pw, c)
            .transpose(0, 1, 3, 2, 4, 5)                       # (n, hr, wr, ph, pw, c)
            .reshape(N, Hr * Wr, 4 * Cin)
            .astype(jnp.bfloat16))

    # Fold inference BatchNorm into the conv weights / a single bias vector.
    scale = (gamma / jnp.sqrt(running_var + eps)).astype(jnp.float32)      # (Cout,)
    bias = (beta - running_mean * scale).astype(jnp.float32).reshape(Cout, 1)
    w_t = jnp.transpose(conv_w.astype(jnp.float32), (2, 3, 1, 0)) * scale  # (4,4,Cin,Cout)
    # Rearrange for the space-to-depth formulation: w2[dh, dw] : (Cout, 4*Cin),
    # flat channel order (ph, pw, cin) matching x2's packing.
    w2 = (w_t.reshape(2, 2, 2, 2, Cin, Cout)      # (dh, ph, dw, pw, cin, cout)
             .transpose(0, 2, 5, 1, 3, 4)          # (dh, dw, cout, ph, pw, cin)
             .reshape(2, 2, Cout, 4 * Cin)
             .astype(jnp.bfloat16))

    m = Ho * Wr
    out = pl.pallas_call(
        _make_downsample_kernel(Ho, Wr),
        out_shape=jax.ShapeDtypeStruct((N, Cout, m), jnp.float32),
        grid_spec=pltpu.PrefetchScalarGridSpec(
            num_scalar_prefetch=0,
            grid=(N,),
            in_specs=[
                pl.BlockSpec((1, Hr * Wr, 4 * Cin), lambda n: (n, 0, 0)),
                # Grid-constant operands (weights / bias).  NOTE: for large Cout on
                # v7x these could be single-buffered with pipeline_mode=pl.Buffered(1).
                pl.BlockSpec((2, 2, Cout, 4 * Cin), lambda n: (0, 0, 0, 0)),
                pl.BlockSpec((Cout, 1), lambda n: (0, 0)),
            ],
            out_specs=pl.BlockSpec((1, Cout, m), lambda n: (n, 0, 0)),
        ),
        compiler_params=pltpu.CompilerParams(
            dimension_semantics=("parallel",),
            vmem_limit_bytes=48 * 1024 * 1024,
        ),
    )(x2, w2, bias)

    # (N, Cout, Ho*Wr) -> (N, Cout, Ho, Wo): drop the single wrap-around halo column
    # per output row (its values are never part of the real output). No transpose.
    return out.reshape(N, Cout, Ho, Wr)[:, :, :, :Wo]


# ----------------------------- references (JAX) -----------------------------

def downsample_reference(x_nchw, conv_w, gamma, beta, running_mean, running_var,
                         eps=1e-5):
    """Module semantics in f32: conv -> inference BN -> LeakyReLU(0.1)."""
    y = lax.conv_general_dilated(
        x_nchw.astype(jnp.float32), conv_w.astype(jnp.float32),
        window_strides=(2, 2), padding=[(1, 1), (1, 1)],
        dimension_numbers=("NCHW", "OIHW", "NCHW"),
        precision=lax.Precision.HIGHEST)
    scale = gamma / jnp.sqrt(running_var + eps)
    bias = beta - running_mean * scale
    y = y * scale[None, :, None, None] + bias[None, :, None, None]
    return jnp.where(y > 0, y, 0.1 * y)


def downsample_reference_bf16(x_nchw, conv_w, gamma, beta, running_mean,
                              running_var, eps=1e-5):
    """Same bf16 rounding of inputs / BN-folded weights as the kernel, f32 accumulation."""
    scale = gamma / jnp.sqrt(running_var + eps)
    bias = beta - running_mean * scale
    wq = (conv_w.astype(jnp.float32) * scale[:, None, None, None]
          ).astype(jnp.bfloat16).astype(jnp.float32)
    xq = x_nchw.astype(jnp.bfloat16).astype(jnp.float32)
    y = lax.conv_general_dilated(
        xq, wq, window_strides=(2, 2), padding=[(1, 1), (1, 1)],
        dimension_numbers=("NCHW", "OIHW", "NCHW"),
        precision=lax.Precision.HIGHEST)
    y = y + bias[None, :, None, None]
    return jnp.where(y > 0, y, 0.1 * y)


# --------------------------------- main --------------------------------------

if __name__ == "__main__":
    key = jax.random.PRNGKey(0)
    k_x, k_w = jax.random.split(key)

    N, Cin, H, W = 2, 4, 16, 16
    Cout = 8

    x = jax.random.normal(k_x, (N, Cin, H, W), dtype=jnp.float32)
    conv_w = jax.random.normal(k_w, (Cout, Cin, 4, 4), dtype=jnp.float32) * 0.1

    # Deterministic (non-trivial) BatchNorm parameters / running stats.
    gamma = 0.5 + 0.1 * jnp.arange(Cout, dtype=jnp.float32)
    beta = 0.1 * jnp.arange(Cout, dtype=jnp.float32) - 0.2
    running_mean = 0.05 * jnp.arange(Cout, dtype=jnp.float32)
    running_var = 1.0 + 0.1 * jnp.arange(Cout, dtype=jnp.float32)

    out = downsample_forward(x, conv_w, gamma, beta, running_mean, running_var)
    out = jax.block_until_ready(out)
    assert out.shape == (N, Cout, H // 2, W // 2), out.shape

    # (1) Semantic check vs the full-f32 module reference.  Loose tolerance because the
    #     kernel deliberately streams activations / folded weights in bf16 (HBM-bound win).
    ref = downsample_reference(x, conv_w, gamma, beta, running_mean, running_var)
    assert jnp.allclose(out, ref, rtol=5e-2, atol=5e-2), "mismatch vs f32 reference"

    # (2) Quantization-matched reference (identical bf16 rounding, f32 accumulation):
    #     tight check of the kernel math itself.
    refq = downsample_reference_bf16(x, conv_w, gamma, beta, running_mean, running_var)
    assert jnp.allclose(out, refq, rtol=2e-3, atol=2e-3), "mismatch vs bf16-matched reference"

    print("KERNEL_OK")
</pallas_src>

<mosaic_0001>
module attributes {stable_mosaic.version = 11 : i64} {
  func.func @kernel(%arg0: i32, %arg1: memref<1x90x16xbf16, #tpu.memory_space<vmem>>, %arg2: memref<2x2x8x16xbf16, #tpu.memory_space<vmem>>, %arg3: memref<8x1xf32, #tpu.memory_space<vmem>>, %arg4: memref<1x8x72xf32, #tpu.memory_space<vmem>>) attributes {dimension_semantics = [#tpu.dimension_semantics<parallel>], iteration_bounds = array<i64: 2>, scalar_prefetch = 0 : i64, scratch_operands = 0 : i64, tpu.core_type = #tpu.core_type<tc>, window_params = [{transform_indices = @transform_0, window_bounds = array<i64: 1, 90, 16>}, {pipeline_mode = #tpu.pipeline_mode<synchronous>, transform_indices = @transform_1, window_bounds = array<i64: 2, 2, 8, 16>}, {pipeline_mode = #tpu.pipeline_mode<synchronous>, transform_indices = @transform_2, window_bounds = array<i64: 8, 1>}, {transform_indices = @transform_3, window_bounds = array<i64: 1, 8, 72>}]} {
    %c0 = arith.constant 0 : index
    %c0_0 = arith.constant 0 : index
    %c0_1 = arith.constant 0 : index
    %0 = vector.load %arg1[%c0, %c0_0, %c0_1] : memref<1x90x16xbf16, #tpu.memory_space<vmem>>, vector<1x72x16xbf16>
    %1 = vector.shape_cast %0 : vector<1x72x16xbf16> to vector<72x16xbf16>
    %c0_2 = arith.constant 0 : index
    %c0_3 = arith.constant 0 : index
    %c0_4 = arith.constant 0 : index
    %c0_5 = arith.constant 0 : index
    %2 = vector.load %arg2[%c0_2, %c0_3, %c0_4, %c0_5] : memref<2x2x8x16xbf16, #tpu.memory_space<vmem>>, vector<1x1x8x16xbf16>
    %3 = vector.shape_cast %2 : vector<1x1x8x16xbf16> to vector<8x16xbf16>
    %cst = arith.constant dense<0.000000e+00> : vector<8x72xf32>
    %4 = tpu.matmul %3, %1, %cst {dimension_numbers = #tpu.dot_dimension_numbers<[1], [1], [0], [0], [0, 0, 1, 0], [], []>} : vector<8x16xbf16>, vector<72x16xbf16>, vector<8x72xf32> -> vector<8x72xf32>
    %c0_6 = arith.constant 0 : index
    %c1 = arith.constant 1 : index
    %c0_7 = arith.constant 0 : index
    %5 = vector.load %arg1[%c0_6, %c1, %c0_7] : memref<1x90x16xbf16, #tpu.memory_space<vmem>>, vector<1x72x16xbf16>
    %6 = vector.shape_cast %5 : vector<1x72x16xbf16> to vector<72x16xbf16>
    %c0_8 = arith.constant 0 : index
    %c1_9 = arith.constant 1 : index
    %c0_10 = arith.constant 0 : index
    %c0_11 = arith.constant 0 : index
    %7 = vector.load %arg2[%c0_8, %c1_9, %c0_10, %c0_11] : memref<2x2x8x16xbf16, #tpu.memory_space<vmem>>, vector<1x1x8x16xbf16>
    %8 = vector.shape_cast %7 : vector<1x1x8x16xbf16> to vector<8x16xbf16>
    %cst_12 = arith.constant dense<0.000000e+00> : vector<8x72xf32>
    %9 = tpu.matmul %8, %6, %cst_12 {dimension_numbers = #tpu.dot_dimension_numbers<[1], [1], [0], [0], [0, 0, 1, 0], [], []>} : vector<8x16xbf16>, vector<72x16xbf16>, vector<8x72xf32> -> vector<8x72xf32>
    %10 = arith.addf %4, %9 : vector<8x72xf32>
    %c0_13 = arith.constant 0 : index
    %c9 = arith.constant 9 : index
    %c0_14 = arith.constant 0 : index
    %11 = vector.load %arg1[%c0_13, %c9, %c0_14] : memref<1x90x16xbf16, #tpu.memory_space<vmem>>, vector<1x72x16xbf16>
    %12 = vector.shape_cast %11 : vector<1x72x16xbf16> to vector<72x16xbf16>
    %c1_15 = arith.constant 1 : index
    %c0_16 = arith.constant 0 : index
    %c0_17 = arith.constant 0 : index
    %c0_18 = arith.constant 0 : index
    %13 = vector.load %arg2[%c1_15, %c0_16, %c0_17, %c0_18] : memref<2x2x8x16xbf16, #tpu.memory_space<vmem>>, vector<1x1x8x16xbf16>
    %14 = vector.shape_cast %13 : vector<1x1x8x16xbf16> to vector<8x16xbf16>
    %cst_19 = arith.constant dense<0.000000e+00> : vector<8x72xf32>
    %15 = tpu.matmul %14, %12, %cst_19 {dimension_numbers = #tpu.dot_dimension_numbers<[1], [1], [0], [0], [0, 0, 1, 0], [], []>} : vector<8x16xbf16>, vector<72x16xbf16>, vector<8x72xf32> -> vector<8x72xf32>
    %16 = arith.addf %10, %15 : vector<8x72xf32>
    %c0_20 = arith.constant 0 : index
    %c10 = arith.constant 10 : index
    %c0_21 = arith.constant 0 : index
    %17 = vector.load %arg1[%c0_20, %c10, %c0_21] : memref<1x90x16xbf16, #tpu.memory_space<vmem>>, vector<1x72x16xbf16>
    %18 = vector.shape_cast %17 : vector<1x72x16xbf16> to vector<72x16xbf16>
    %c1_22 = arith.constant 1 : index
    %c1_23 = arith.constant 1 : index
    %c0_24 = arith.constant 0 : index
    %c0_25 = arith.constant 0 : index
    %19 = vector.load %arg2[%c1_22, %c1_23, %c0_24, %c0_25] : memref<2x2x8x16xbf16, #tpu.memory_space<vmem>>, vector<1x1x8x16xbf16>
    %20 = vector.shape_cast %19 : vector<1x1x8x16xbf16> to vector<8x16xbf16>
    %cst_26 = arith.constant dense<0.000000e+00> : vector<8x72xf32>
    %21 = tpu.matmul %20, %18, %cst_26 {dimension_numbers = #tpu.dot_dimension_numbers<[1], [1], [0], [0], [0, 0, 1, 0], [], []>} : vector<8x16xbf16>, vector<72x16xbf16>, vector<8x72xf32> -> vector<8x72xf32>
    %22 = arith.addf %16, %21 : vector<8x72xf32>
    %c0_27 = arith.constant 0 : index
    %c0_28 = arith.constant 0 : index
    %23 = vector.load %arg3[%c0_27, %c0_28] : memref<8x1xf32, #tpu.memory_space<vmem>>, vector<8x1xf32>
    %24 = vector.broadcast %23 : vector<8x1xf32> to vector<8x72xf32>
    %25 = arith.addf %22, %24 : vector<8x72xf32>
    %cst_29 = arith.constant 0.000000e+00 : f32
    %26 = vector.broadcast %cst_29 : f32 to vector<8x72xf32>
    %27 = arith.cmpf ogt, %25, %26 : vector<8x72xf32>
    %cst_30 = arith.constant 1.000000e-01 : f32
    %28 = vector.broadcast %cst_30 : f32 to vector<8x72xf32>
    %29 = arith.mulf %28, %25 : vector<8x72xf32>
    %30 = arith.select %27, %25, %29 : vector<8x72xi1>, vector<8x72xf32>
    %c0_31 = arith.constant 0 : index
    %c0_32 = arith.constant 0 : index
    %c0_33 = arith.constant 0 : index
    %31 = vector.load %arg4[%c0_31, %c0_32, %c0_33] : memref<1x8x72xf32, #tpu.memory_space<vmem>>, vector<1x8x72xf32>
    %32 = vector.shape_cast %31 : vector<1x8x72xf32> to vector<8x72xf32>
    %33 = vector.shape_cast %30 : vector<8x72xf32> to vector<1x8x72xf32>
    tpu.vector_store %arg4[%c0_31, %c0_32, %c0_33], %33 {strides = array<i32>} : memref<1x8x72xf32, #tpu.memory_space<vmem>>, vector<1x8x72xf32>,
    return
  }
  func.func @transform_0(%arg0: i32) -> (i32, i32, i32) {
    %c0_i32 = arith.constant 0 : i32
    %c0_i32_0 = arith.constant 0 : i32
    %c0_i32_1 = arith.constant 0 : i32
    return %arg0, %c0_i32, %c0_i32_0 : i32, i32, i32
  }
  func.func @transform_1(%arg0: i32) -> (i32, i32, i32, i32) {
    %c0_i32 = arith.constant 0 : i32
    %c0_i32_0 = arith.constant 0 : i32
    %c0_i32_1 = arith.constant 0 : i32
    %c0_i32_2 = arith.constant 0 : i32
    %c0_i32_3 = arith.constant 0 : i32
    return %c0_i32, %c0_i32_0, %c0_i32_1, %c0_i32_2 : i32, i32, i32, i32
  }
  func.func @transform_2(%arg0: i32) -> (i32, i32) {
    %c0_i32 = arith.constant 0 : i32
    %c0_i32_0 = arith.constant 0 : i32
    %c0_i32_1 = arith.constant 0 : i32
    return %c0_i32, %c0_i32_0 : i32, i32
  }
  func.func @transform_3(%arg0: i32) -> (i32, i32, i32) {
    %c0_i32 = arith.constant 0 : i32
    %c0_i32_0 = arith.constant 0 : i32
    %c0_i32_1 = arith.constant 0 : i32
    return %arg0, %c0_i32, %c0_i32_0 : i32, i32, i32
  }
}

</mosaic_0001>

<bundles_post_ra>
// kernel: downsample_forward.1
= control target key start
LH: loop header
LB: loop body
LE: loop exit
PB: predicated region body
PF: predicated region fallthrough
CT: control target
= control target key end

     0   :  { %s628_s12 = smov 0   ;;  %s721_s0 = inlined_call_operand.vmem [shape: bf16[2,90,16], index: 0, kind: input, shape index: {}]   ;;  %s722_s1 = inlined_call_operand.vmem [shape: bf16[2,2,8,16], index: 1, kind: input, shape index: {}]   ;;  %s723_s2 = inlined_call_operand.vmem [shape: f32[8,1], index: 2, kind: input, shape index: {}]   ;;  %s724_s3 = inlined_call_operand.vmem [shape: f32[2,8,72], index: 3, kind: output, shape index: {}]  }
   0x1 LB: > { %s529_s13 = sadd.s32 4294967295, %s605_s12   ;;  %p533_p0 = scmp.ge.s32.totalorder %s605_s12, 1  ;;  %s605_s12 = sphi %s628_s12, %s13_s12  }
   0x2   : > { %p137_p1 = scmp.lt.s32.totalorder %s605_s12, 3 }
   0x4   : > { %p138_p2 = pnand %p533_p0, %p137_p1 }
   0x5   : > { %p160_p3 = scmp.lt.s32.totalorder (!%p138_p2), %s529_s13, 1 }
   0x6   : > { %141 = sbr.rel (%p138_p2) target bundleno = 206 (0xce), region = 32 }
   0xb   : > { %s726_s13 = smov (!%p160_p3, %s529_s13), 1  ;;  %vm248_vm0 = vcmask 130048   ;;  %vm422_vm1 = vcmask 1046528   ;;  %vm208_vm2 = vsmask.f32 7424  ;;  %vm474_vm3 = vcmask 588800  }
   0xc   : > { %s585_s14 = smul.u32 48, %s726_s13  ;;  %s535_s28 = sshll.u32 %s726_s13, 3 }
   0xd   : > { %s168_s4 = scalar_lea.vmem %s724_s3, %s535_s28 }
   0xe   : > { %s642_s17 = scalar_lea.vmem %s721_s0, %s585_s14 }
   0xf   : > { %v178_v0 = vld [vmem:[%s642_s17 + $0x20] sm:$0xf]  ;;  %v570_v1 = vld [vmem:[%s642_s17 + $0x24] sm:$0xf]  ;;  %v584_v2 = vld [vmem:[%s642_s17 + $0x24] sm:$0x10] }
  0x10   : > { %v201_v3 = vunpack.c.l.b16 %v178_v0  ;;  %v571_v4 = vor.u32 %v584_v2, %v570_v1  ;;  %v180_v5 = vld [vmem:[%s642_s17 + $0x24] sm:$0x1]  ;;  %v583_v6 = vld [vmem:[%s642_s17 + $0x1c] sm:$0xff]  ;;  %v653_v20 = vld [vmem:[%s642_s17 + $0x14] sm:$0xff] }
  0x11   : > { %v202_v7 = vunpack.c.l.b16 %v180_v5  ;;  %v580_v12 = vld [vmem:[%s642_s17 + $0x18] sm:$0xff]  ;;  %v428_v14 = vrot.slane %v583_v6, 1  ;;  %v369_v15 = vshll.u32 %v583_v6, 16  ;;  %v373_v19 = vshrl.u32 %v583_v6, 16  ;;  %v579_v27 = vld [vmem:[%s642_s17 + $0x10] sm:$0xff]  ;;  %v309_v46 = vld [vmem:[%s642_s17 + $0x4] sm:$0xff]  }
  0x12   : > { %v280_v8 = vpack.c.b16 %v201_v3, %v201_v3  ;;  %v430_v9 = vrot.slane %v571_v4, 1  ;;  %v377_v10 = vshll.u32 %v571_v4, 16  ;;  %v381_v11 = vshrl.u32 %v571_v4, 16  ;;  %v581_v44 = vld [vmem:[%s642_s17 + $0xc] sm:$0xff]  ;;  %v596_v47 = vld [vmem:[%s642_s17 + $0x4] sm:$0xf0] }
  0x13   : > { %v207_v13 = vpack.c.b16 %v202_v7, %v201_v3  ;;  %v371_v23 = vrot.slane %v369_v15, 1  ;;  %v233_v25 = vshll.u32 %v580_v12, 16  ;;  %v237_v26 = vshrl.u32 %v580_v12, 16  ;;  %v578_v52 = vld [vmem:[%s642_s17 + $0x8] sm:$0xff]  ;;  %v597_v55 = vld [vmem:[%s642_s17 + $0x4] sm:$0xe] }
  0x14   : > { %v293_v16 = vsel %vm248_vm0, %v280_v8, 0  ;;  %v448_v17 = vsel %vm248_vm0, %v430_v9, 0  ;;  %v379_v18 = vrot.slane %v377_v10, 1  ;;  %v431_v29 = vsel %vm422_vm1, %v428_v14, %v430_v9  ;;  %v464_v1 = vld [vmem:[%s723_s2] sm:$0xff] }
  0x15   : > { %298 = vmatpush.bf16.xpose.msra.mxu1 %v293_v16  ;;  %453 = vmatpush.bf16.xpose.msra.mxu3 %v448_v17  ;;  %v241_v21 = vshll.u32 %v207_v13, 16  ;;  %v245_v22 = vshrl.u32 %v207_v13, 16  ;;  %v375_v30 = vor.u32 %v373_v19, %v371_v23  ;;  %v235_v32 = vrot.slane %v233_v25, 1  ;;  %v577_v6 = vld [vmem:[%s642_s17] sm:$0xff] }
  0x16   : > { %v383_v24 = vor.u32 %v381_v11, %v379_v18  ;;  %v361_v33 = vshll.u32 %v653_v20, 16  ;;  %v426_v35 = vrot.slane %v653_v20, 1  ;;  %v290_v36 = vsel %vm248_vm0, %v580_v12, 0 }
  0x17   : > { %v243_v28 = vrot.slane %v241_v21, 1  ;;  %v445_v37 = vsel %vm248_vm0, %v431_v29, 0  ;;  %v239_v38 = vor.u32 %v237_v26, %v235_v32  ;;  %v225_v39 = vshll.u32 %v579_v27, 16 }
  0x18   : > { %v400_v31 = vsel %vm248_vm0, %v383_v24, 0  ;;  %v380_v41 = vsel %vm208_vm2, %v375_v30, %v379_v18  ;;  %v363_v42 = vrot.slane %v361_v33, 1  ;;  %v365_v43 = vshrl.u32 %v653_v20, 16 }
  0x19   : > { %405 = vmatpush.bf16.xpose.msra.mxu2 %v400_v31  ;;  %v247_v34 = vor.u32 %v245_v22, %v243_v28  ;;  %v429_v45 = vsel %vm422_vm1, %v426_v35, %v428_v14  ;;  %v397_v48 = vsel %vm248_vm0, %v380_v41, 0  ;;  %v244_v49 = vsel %vm208_vm2, %v239_v38, %v243_v28  ;;  %v536_v38 = vld [vmem:[%s722_s1 + $0x4] sm:$0xf] }
  0x1a   : > { %v227_v50 = vrot.slane %v225_v39, 1  ;;  %v229_v51 = vshrl.u32 %v579_v27, 16  ;;  %v367_v53 = vor.u32 %v365_v43, %v363_v42  ;;  %v353_v54 = vshll.u32 %v581_v44, 16 }
  0x1b   : > { %v265_v40 = vsel %vm248_vm0, %v247_v34, 0  ;;  %v262_v56 = vsel %vm248_vm0, %v244_v49, 0  ;;  %v288_v57 = vsel %vm248_vm0, %v579_v27, 0  ;;  %v442_v58 = vsel %vm248_vm0, %v429_v45, 0 }
  0x1c   : > { %270 = vmatpush.bf16.xpose.msra.mxu0 %v265_v40  ;;  %v231_v59 = vor.u32 %v229_v51, %v227_v50  ;;  %v424_v60 = vrot.slane %v581_v44, 1  ;;  %v357_v61 = vshrl.u32 %v581_v44, 16  ;;  %v217_v62 = vshll.u32 %v578_v52, 16 }
  0x1d   : > { %299 = vmatpush.bf16.xpose.msra.mxu1 %v290_v36  ;;  %454 = vmatpush.bf16.xpose.msra.mxu3 %v445_v37  ;;  %v372_v63 = vsel %vm208_vm2, %v367_v53, %v371_v23  ;;  %v355_v0 = vrot.slane %v353_v54, 1  ;;  %v221_v5 = vshrl.u32 %v578_v52, 16  ;;  %v607_v7 = vmov 0   ;;  %v573_v36 = vld [vmem:[%s722_s1 + $0xc] sm:$0xf] }
  0x1e   : > { %v394_v2 = vsel %vm248_vm0, %v372_v63, 0  ;;  %v236_v3 = vsel %vm208_vm2, %v231_v59, %v235_v32  ;;  %v219_v4 = vrot.slane %v217_v62, 1  ;;  %595 = vset.pattern.permute.xlu0 %v607_v7  ;;  %v427_v8 = vsel %vm422_vm1, %v424_v60, %v426_v35  ;;  %v179_v35 = vld [vmem:[%s722_s1] sm:$0xf]  ;;  %v555_v37 = vld [vmem:[%s722_s1 + $0x8] sm:$0xf] }
  0x1f   : > { %v359_v9 = vor.u32 %v357_v61, %v355_v0  ;;  %v598_v10 = vor.u32 %v597_v55, %v596_v47  ;;  %v348_v11 = vshll.u32 %v309_v46, 16  ;;  %467 = vperm.xlu0 %595, %v464_v1   ;;  %v259_v12 = vsel %vm248_vm0, %v236_v3, 0 }
  0x20   : > { %v286_v13 = vsel %vm248_vm0, %v578_v52, 0  ;;  %v439_v14 = vsel %vm248_vm0, %v427_v8, 0  ;;  %v223_v15 = vor.u32 %v221_v5, %v219_v4  ;;  %v212_v16 = vshll.u32 %v577_v6, 16 }
  0x21   : > { %406 = vmatpush.bf16.xpose.msra.mxu2 %v397_v48  ;;  %v364_v17 = vsel %vm208_vm2, %v359_v9, %v363_v42  ;;  %v423_v18 = vrot.slane %v598_v10, 1  ;;  %v346_v19 = vshrl.u32 %v309_v46, 16  ;;  %v350_v20 = vrot.slane %v348_v11, 1 }
  0x22   : > { %v391_v21 = vsel %vm248_vm0, %v364_v17, 0  ;;  %v228_v22 = vsel %vm208_vm2, %v223_v15, %v227_v50  ;;  %v210_v23 = vshrl.u32 %v577_v6, 16  ;;  %v214_v24 = vrot.slane %v212_v16, 1 }
  0x23   : > { %v425_v25 = vsel %vm422_vm1, %v423_v18, %v424_v60  ;;  %v351_v26 = vor.u32 %v350_v20, %v346_v19  ;;  %v256_v27 = vsel %vm248_vm0, %v228_v22, 0  ;;  %v284_v28 = vsel %vm248_vm0, %v577_v6, 0 }
  0x24   : > { %271 = vmatpush.bf16.xpose.msra.mxu0 %v262_v56  ;;  %v436_v29 = vsel %vm248_vm0, %v425_v25, 0  ;;  %v215_v30 = vor.u32 %v214_v24, %v210_v23 }
  0x25   : > { %300 = vmatpush.bf16.xpose.msra.mxu1 %v288_v57  ;;  %455 = vmatpush.bf16.xpose.msra.mxu3 %v442_v58  ;;  %v356_v31 = vsel %vm208_vm2, %v351_v26, %v355_v0 }
  0x26   : > { %v388_v32 = vsel %vm248_vm0, %v356_v31, 0  ;;  %v220_v33 = vsel %vm208_vm2, %v215_v30, %v219_v4 }
  0x27   : > { %v253_v34 = vsel %vm248_vm0, %v220_v33, 0 }
  0x29   : > { %407 = vmatpush.bf16.xpose.msra.mxu2 %v394_v2 }
  0x2c   : > { %272 = vmatpush.bf16.xpose.msra.mxu0 %v259_v12 }
  0x2d   : > { %301 = vmatpush.bf16.xpose.msra.mxu1 %v286_v13  ;;  %456 = vmatpush.bf16.xpose.msra.mxu3 %v439_v14 }
  0x31   : > { %408 = vmatpush.bf16.xpose.msra.mxu2 %v391_v21 }
  0x34   : > { %273 = vmatpush.bf16.xpose.msra.mxu0 %v256_v27 }
  0x35   : > { %302 = vmatpush.bf16.xpose.msra.mxu1 %v284_v28  ;;  %457 = vmatpush.bf16.xpose.msra.mxu3 %v436_v29 }
  0x39   : > { %409 = vmatpush.bf16.xpose.msra.mxu2 %v388_v32 }
  0x3c   : > { %274 = vmatpush.bf16.xpose.msra.mxu0 %v253_v34  ;;  %554 = vmatmul.msk.bf16.vlgmr.msra.gmra.mxu1 %vm248_vm0, %v179_v35 }
  0x3d   : > { %574 = vmatmul.msk.bf16.vlgmr.msra.gmra.mxu3 %vm248_vm0, %v573_v36 }
  0x40   : > { %572 = vmatmul.msk.bf16.vlgmr.msra.gmra.mxu2 %vm248_vm0, %v555_v37 }
  0x43   : > { %553 = vmatmul.msk.bf16.vlgmr.msra.gmra.mxu0 %vm248_vm0, %v536_v38 }
  0x91   : > { %v468_v46 = vpop.permute.xlu0 %467 }
  0xb9   : > { %v304_v39 = vpop.f32.mrf.mxu1 }
  0xc0   : > { %v276_v40 = vpop.f32.mrf.mxu0  ;;  %v459_v41 = vpop.f32.mrf.mxu3 }
  0xc1   : > { %v305_v42 = vadd.f32 %v304_v39, %v276_v40  ;;  %v306_v43 = vpop.f32.mrf.mxu1 }
  0xc3   : > { %v411_v44 = vpop.f32.mrf.mxu2 }
  0xc4   : > { %v415_v45 = vadd.f32 %v411_v44, %v305_v42 }
  0xc6   : > { %v463_v47 = vadd.f32 %v459_v41, %v415_v45 }
  0xc8   : > { %v470_v48 = vadd.f32 %v468_v46, %v463_v47  ;;  %v278_v49 = vpop.f32.mrf.mxu0  ;;  %v461_v50 = vpop.f32.mrf.mxu3 }
  0xca   : > { %vm471_vm4 = vcmp.gt.f32.partialorder %v470_v48, 0.0  ;;  %v472_v51 = vmul.f32 0.1, %v470_v48 }
  0xcb   : > { %v413_v52 = vpop.f32.mrf.mxu2 }
  0xcc   : > { %v473_v53 = vsel %vm471_vm4, %v470_v48, %v472_v51 }
  0xcd   : > { %475 = vst.msk [vmem:[%s168_s4] sm:$0xff] %vm474_vm3, %v473_v53 }
  0xce PF: > { %s13_s12 = sadd.s32 1, %s605_s12  }
  0xcf   : > { %p10_p4 = scmp.ge.s32.totalorder %s13_s12, 4  }
  0xd1   :  { %12 = sbr.rel (!%p10_p4) target bundleno = 1 (0x1), region = 65 }

</bundles_post_ra>
